<compile_context>
chip_gen: v5e
topology: v5e:2x2
jax: 0.10.0
libtpu: 0.0.40
codegen_flags: <defaults>
</compile_context>

<pallas_src>
import math

import jax
import jax.numpy as jnp
from jax.experimental import pallas as pl
from jax.experimental.pallas import tpu as pltpu


# ------------------------------ kernel body ----------------------------------


def _make_ln_kernel(*, eps: float, inv_d: float, k: int, affine: bool,
                    use_mxu_reduce: bool, precision):
    """Builds a LayerNorm kernel body.

    Tile layout is (row_tile, L) with L = k * D: each physical row packs k
    independent logical rows of length D along lanes (k == 1 is the ordinary
    layout).  Statistics are computed in f32 with a two-pass (centered)
    variance.  When `use_mxu_reduce`, the row reductions (and, for k > 1, the
    per-segment broadcast back to lanes) run on the MXU via small constant 0/1
    matrices, leaving the VALU slot for the streaming normalize/affine work.
    """

    def kernel(*refs):
        it = iter(refs)
        x_ref = next(it)
        seg_ref = next(it) if use_mxu_reduce else None   # (L, k) 0/1, f32
        bcast_ref = next(it) if k > 1 else None          # (k, L) 0/1, f32
        w_ref = next(it) if affine else None             # (1, L) f32
        b_ref = next(it) if affine else None             # (1, L) f32
        o_ref = next(it)

        x = x_ref[...].astype(jnp.float32)               # (T, L)

        # mean (two-pass / centered variance matches F.layer_norm exactly and
        # avoids the E[x^2] - E[x]^2 cancellation problem).
        if use_mxu_reduce:
            seg = seg_ref[...]
            s = jnp.dot(x, seg, precision=precision,
                        preferred_element_type=jnp.float32)          # (T, k) MXU
        else:
            s = jnp.sum(x, axis=-1, keepdims=True)                   # (T, 1) VPU
        mean = s * inv_d
        if k > 1:  # broadcast per-segment mean back to all lanes (MXU)
            mean = jnp.dot(mean, bcast_ref[...], precision=precision,
                           preferred_element_type=jnp.float32)       # (T, L)
        xc = x - mean

        if use_mxu_reduce:
            ss = jnp.dot(xc * xc, seg, precision=precision,
                         preferred_element_type=jnp.float32)         # (T, k)
        else:
            ss = jnp.sum(xc * xc, axis=-1, keepdims=True)            # (T, 1)
        inv = jax.lax.rsqrt(ss * inv_d + eps)
        if k > 1:
            inv = jnp.dot(inv, bcast_ref[...], precision=precision,
                          preferred_element_type=jnp.float32)        # (T, L)

        y = xc * inv
        if affine:
            y = y * w_ref[...] + b_ref[...]              # params already f32
        o_ref[...] = y.astype(o_ref.dtype)

    return kernel


# ------------------------------ tiling policy ---------------------------------


def _cdiv(a: int, b: int) -> int:
    return -(-a // b)


def _round_up(a: int, b: int) -> int:
    return ((a + b - 1) // b) * b


def _physical_vmem_bytes() -> int:
    # Generation-aware: 128 MiB on v5e/v6e, 64 MiB per TensorCore on v7x.
    try:
        info = pltpu.get_tpu_info()
        v = int(getattr(info, "vmem_capacity_bytes", 0) or 0)
        if v > 0:
            return v
    except Exception:
        pass
    return 64 * 1024 * 1024   # assume the smallest (v7x) if the query fails


def _vmem_budget_and_limit() -> tuple[int, int]:
    phys = _physical_vmem_bytes()
    # Scoped-VMEM limit: 3/4 of physical, capped at 96 MiB (=> 96 MiB on
    # v5e/v6e's 128 MiB, 48 MiB on v7x's 64 MiB).  Live-tile budget is half the
    # limit, leaving headroom for the pipeline's double buffers and
    # Mosaic-internal temporaries.
    limit = min((3 * phys) // 4, 96 * 1024 * 1024)
    return limit // 2, limit


def _pick_row_tile(rows: int, lane_width: int, itemsize: int,
                   vmem_budget: int) -> int:
    """Rows per grid step: as big as the VMEM budget allows, but keep >= 2 grid
    steps (both v7x TensorCores get work), prefer an even step count, and
    prefer ~8 steps when tiles stay comfortably large (>= 512 rows)."""
    packing = {4: 8, 2: 16, 1: 32}.get(itemsize, 8)
    if rows <= packing:
        return rows                       # single (possibly ragged) full block
    # Per-row VMEM: in + out tiles (double-buffered by the pipeline) plus ~two
    # f32 working tiles inside the kernel (x/xc and the pre-store y).
    bytes_per_row = 2 * 2 * lane_width * itemsize + 2 * lane_width * 4
    budget_rows = max(packing, vmem_budget // bytes_per_row)
    cap = _round_up(_cdiv(rows, 2), packing)          # ensure >= 2 grid steps
    eighth = _round_up(_cdiv(rows, 8), packing)
    if eighth >= 512:                                 # prefer ~8 steps if big
        cap = min(cap, eighth)
    tile = min(budget_rows, cap)
    tile = max(packing, (tile // packing) * packing)
    steps = _cdiv(rows, tile)
    if steps > 1 and steps % 2 == 1:                  # prefer an even count
        tile = max(packing, _round_up(_cdiv(rows, steps + 1), packing))
    return tile


def _repack_factor(d: int, rows: int) -> int:
    # Pack k = 128 // d logical rows into one 128-lane physical row so stores
    # are lane-dense (unmasked vst) when d_model < 128.
    if 0 < d < 128 and 128 % d == 0:
        k = 128 // d
        if rows % k == 0:
            return k
    return 1


# ------------------------------ wrapper ---------------------------------------


def _layer_norm_2d(x, weight, bias, *, eps, row_tile, k):
    orig_shape = x.shape
    d = orig_shape[-1]
    rows = math.prod(orig_shape[:-1]) if len(orig_shape) > 1 else 1
    dtype = x.dtype
    itemsize = jnp.dtype(dtype).itemsize

    lane = k * d
    rows_eff = rows // k
    x2 = x.reshape(rows_eff, lane)

    budget, limit = _vmem_budget_and_limit()
    if row_tile is None:
        row_tile = _pick_row_tile(rows_eff, lane, itemsize, budget)
    grid = (pl.cdiv(rows_eff, row_tile),)

    has_affine = (weight is not None) or (bias is not None)
    # MXU reductions: required for the packed (k > 1) segmented layout, and
    # worthwhile for sub-32-bit inputs where the VALU slot (not HBM) limits
    # v7x.  f32 inputs keep exact VPU sums (the kernel is HBM-bound there).
    use_mxu_reduce = (k > 1) or (itemsize < 4)
    # f32 operands need the multi-pass (full f32) MXU algorithm so the mean /
    # variance keep f32 accuracy; bf16 inputs are fine at default precision.
    precision = (jax.lax.Precision.HIGHEST if itemsize >= 4
                 else jax.lax.Precision.DEFAULT)

    kernel = _make_ln_kernel(eps=float(eps), inv_d=1.0 / float(d), k=k,
                             affine=has_affine, use_mxu_reduce=use_mxu_reduce,
                             precision=precision)

    inputs = [x2]
    in_specs = [pl.BlockSpec((row_tile, lane), lambda i: (i, 0))]
    if use_mxu_reduce:
        if k > 1:
            seg = (jnp.arange(lane)[:, None] // d
                   == jnp.arange(k)[None, :]).astype(jnp.float32)     # (L, k)
        else:
            seg = jnp.ones((d, 1), dtype=jnp.float32)                 # (D, 1)
        inputs.append(seg)
        in_specs.append(pl.BlockSpec((lane, k), lambda i: (0, 0)))
        if k > 1:
            inputs.append(seg.T)                                       # (k, L)
            in_specs.append(pl.BlockSpec((k, lane), lambda i: (0, 0)))
    if has_affine:
        w = weight if weight is not None else jnp.ones((d,), dtype=dtype)
        b = bias if bias is not None else jnp.zeros((d,), dtype=dtype)
        # Pre-cast to f32 and pre-tile to the packed lane width here so the
        # kernel does no per-step casting of the affine params.
        inputs.append(jnp.tile(w.astype(jnp.float32), (k,)).reshape(1, lane))
        inputs.append(jnp.tile(b.astype(jnp.float32), (k,)).reshape(1, lane))
        in_specs.append(pl.BlockSpec((1, lane), lambda i: (0, 0)))
        in_specs.append(pl.BlockSpec((1, lane), lambda i: (0, 0)))

    # NOTE: when rows_eff % row_tile != 0 the final block is partial.  Rows are
    # normalized independently, and Pallas masks the write-back of the
    # out-of-range rows, so the garbage rows of the partial block are computed
    # but never stored.
    out = pl.pallas_call(
        kernel,
        out_shape=jax.ShapeDtypeStruct((rows_eff, lane), dtype),
        grid_spec=pltpu.PrefetchScalarGridSpec(
            num_scalar_prefetch=0,
            grid=grid,
            in_specs=in_specs,
            out_specs=pl.BlockSpec((row_tile, lane), lambda i: (i, 0)),
        ),
        compiler_params=pltpu.CompilerParams(
            dimension_semantics=("parallel",),
            vmem_limit_bytes=limit,
        ),
    )(*inputs)

    return out.reshape(orig_shape)


def layer_norm(x: jax.Array,
               weight: jax.Array | None = None,
               bias: jax.Array | None = None,
               *,
               eps: float = 1e-5,
               row_tile: int | None = None) -> jax.Array:
    """LayerNorm over the last dim of x, matching F.layer_norm semantics."""
    d = x.shape[-1]
    rows = math.prod(x.shape[:-1]) if x.ndim > 1 else 1
    k = _repack_factor(d, rows)
    if k > 1:
        try:
            return _layer_norm_2d(x, weight, bias, eps=eps, row_tile=row_tile, k=k)
        except Exception:
            # TODO(synk): lane-packed variant failed to lower on this
            # toolchain; fall back to the plain (masked-store) layout.
            pass
    return _layer_norm_2d(x, weight, bias, eps=eps, row_tile=row_tile, k=1)


# ------------------------------ reference / test ------------------------------


def _reference(x, weight, bias, eps):
    xf = x.astype(jnp.float32)
    mean = jnp.mean(xf, axis=-1, keepdims=True)
    var = jnp.mean((xf - mean) ** 2, axis=-1, keepdims=True)
    y = (xf - mean) * jax.lax.rsqrt(var + eps)
    if weight is not None:
        y = y * weight.astype(jnp.float32)
    if bias is not None:
        y = y + bias.astype(jnp.float32)
    return y.astype(x.dtype)


if __name__ == "__main__":
    eps = 1e-5
    key = jax.random.PRNGKey(0)

    # Module config (synthetic): d_model=32, include_bias=True,
    # elementwise_affine=True, eps=1e-5; params as reset_parameters() leaves
    # them (weight=ones, bias=zeros).
    batch, seq, d_model = 2, 8, 32
    x = jax.random.normal(key, (batch, seq, d_model), dtype=jnp.float32)
    weight = jnp.ones((d_model,), dtype=jnp.float32)
    bias = jnp.zeros((d_model,), dtype=jnp.float32)
    y = jax.block_until_ready(layer_norm(x, weight, bias, eps=eps))
    assert jnp.allclose(y, _reference(x, weight, bias, eps),
                        atol=1e-5, rtol=1e-5), "mismatch (f32, packed lanes)"

    # Ragged row count (no clean lane repack; masked final block) with a
    # non-trivial affine transform.
    k1, k2, k3 = jax.random.split(key, 3)
    x2 = jax.random.normal(k1, (3, 5, d_model), dtype=jnp.float32)
    w2 = 1.0 + 0.1 * jax.random.normal(k2, (d_model,), dtype=jnp.float32)
    b2 = 0.1 * jax.random.normal(k3, (d_model,), dtype=jnp.float32)
    y2 = jax.block_until_ready(layer_norm(x2, w2, b2, eps=eps))
    assert jnp.allclose(y2, _reference(x2, w2, b2, eps),
                        atol=1e-5, rtol=1e-5), "mismatch (f32, ragged/affine)"

    # Wider hidden dim (standard k == 1 path, exact VPU reductions), no affine.
    x3 = jax.random.normal(jax.random.PRNGKey(1), (4, 16, 256), dtype=jnp.float32)
    y3 = jax.block_until_ready(layer_norm(x3, None, None, eps=eps))
    assert jnp.allclose(y3, _reference(x3, None, None, eps),
                        atol=1e-5, rtol=1e-5), "mismatch (f32, no-affine)"

    # bf16 paths (MXU row reductions): packed narrow-D and standard wide-D.
    xb = jax.random.normal(jax.random.PRNGKey(2), (2, 8, d_model)).astype(jnp.bfloat16)
    wb = (1.0 + 0.1 * jax.random.normal(k2, (d_model,))).astype(jnp.bfloat16)
    bb = (0.1 * jax.random.normal(k3, (d_model,))).astype(jnp.bfloat16)
    yb = jax.block_until_ready(layer_norm(xb, wb, bb, eps=eps))
    assert jnp.allclose(yb.astype(jnp.float32),
                        _reference(xb, wb, bb, eps).astype(jnp.float32),
                        atol=5e-2, rtol=5e-2), "mismatch (bf16, packed lanes)"

    xw = jax.random.normal(jax.random.PRNGKey(3), (4, 16, 256)).astype(jnp.bfloat16)
    yw = jax.block_until_ready(layer_norm(xw, None, None, eps=eps))
    assert jnp.allclose(yw.astype(jnp.float32),
                        _reference(xw, None, None, eps).astype(jnp.float32),
                        atol=5e-2, rtol=5e-2), "mismatch (bf16, wide)"

    print("KERNEL_OK")
</pallas_src>

<mosaic_0001>
module attributes {stable_mosaic.version = 11 : i64} {
  func.func @kernel(%arg0: i32, %arg1: memref<4x128xf32, #tpu.memory_space<vmem>>, %arg2: memref<128x4xf32, #tpu.memory_space<vmem>>, %arg3: memref<4x128xf32, #tpu.memory_space<vmem>>, %arg4: memref<1x128xf32, #tpu.memory_space<vmem>>, %arg5: memref<1x128xf32, #tpu.memory_space<vmem>>, %arg6: memref<4x128xf32, #tpu.memory_space<vmem>>) attributes {dimension_semantics = [#tpu.dimension_semantics<parallel>], iteration_bounds = array<i64: 1>, scalar_prefetch = 0 : i64, scratch_operands = 0 : i64, tpu.core_type = #tpu.core_type<tc>, window_params = [{transform_indices = @transform_0, window_bounds = array<i64: 4, 128>}, {pipeline_mode = #tpu.pipeline_mode<synchronous>, transform_indices = @transform_1, window_bounds = array<i64: 128, 4>}, {pipeline_mode = #tpu.pipeline_mode<synchronous>, transform_indices = @transform_2, window_bounds = array<i64: 4, 128>}, {pipeline_mode = #tpu.pipeline_mode<synchronous>, transform_indices = @transform_3, window_bounds = array<i64: 1, 128>}, {pipeline_mode = #tpu.pipeline_mode<synchronous>, transform_indices = @transform_4, window_bounds = array<i64: 1, 128>}, {transform_indices = @transform_5, window_bounds = array<i64: 4, 128>}]} {
    %c0 = arith.constant 0 : index
    %c0_0 = arith.constant 0 : index
    %0 = vector.load %arg1[%c0, %c0_0] : memref<4x128xf32, #tpu.memory_space<vmem>>, vector<4x128xf32>
    %c0_1 = arith.constant 0 : index
    %c0_2 = arith.constant 0 : index
    %1 = vector.load %arg2[%c0_1, %c0_2] : memref<128x4xf32, #tpu.memory_space<vmem>>, vector<128x4xf32>
    %cst = arith.constant dense<0.000000e+00> : vector<4x4xf32>
    %2 = tpu.matmul %0, %1, %cst {dimension_numbers = #tpu.dot_dimension_numbers<[1], [0], [0], [1], [0, 0, 1, 1], [], []>, precision = #tpu.contract_precision<fp32>} : vector<4x128xf32>, vector<128x4xf32>, vector<4x4xf32> -> vector<4x4xf32>
    %cst_3 = arith.constant 3.125000e-02 : f32
    %3 = vector.broadcast %cst_3 : f32 to vector<4x4xf32>
    %4 = arith.mulf %2, %3 : vector<4x4xf32>
    %c0_4 = arith.constant 0 : index
    %c0_5 = arith.constant 0 : index
    %5 = vector.load %arg3[%c0_4, %c0_5] : memref<4x128xf32, #tpu.memory_space<vmem>>, vector<4x128xf32>
    %cst_6 = arith.constant dense<0.000000e+00> : vector<4x128xf32>
    %6 = tpu.matmul %4, %5, %cst_6 {dimension_numbers = #tpu.dot_dimension_numbers<[1], [0], [0], [1], [0, 0, 1, 1], [], []>, precision = #tpu.contract_precision<fp32>} : vector<4x4xf32>, vector<4x128xf32>, vector<4x128xf32> -> vector<4x128xf32>
    %7 = arith.subf %0, %6 : vector<4x128xf32>
    %8 = arith.mulf %7, %7 : vector<4x128xf32>
    %cst_7 = arith.constant dense<0.000000e+00> : vector<4x4xf32>
    %9 = tpu.matmul %8, %1, %cst_7 {dimension_numbers = #tpu.dot_dimension_numbers<[1], [0], [0], [1], [0, 0, 1, 1], [], []>, precision = #tpu.contract_precision<fp32>} : vector<4x128xf32>, vector<128x4xf32>, vector<4x4xf32> -> vector<4x4xf32>
    %cst_8 = arith.constant 3.125000e-02 : f32
    %10 = vector.broadcast %cst_8 : f32 to vector<4x4xf32>
    %11 = arith.mulf %9, %10 : vector<4x4xf32>
    %cst_9 = arith.constant 9.99999974E-6 : f32
    %12 = vector.broadcast %cst_9 : f32 to vector<4x4xf32>
    %13 = arith.addf %11, %12 : vector<4x4xf32>
    %14 = math.rsqrt %13 : vector<4x4xf32>
    %c0_10 = arith.constant 0 : index
    %c0_11 = arith.constant 0 : index
    %15 = vector.load %arg3[%c0_10, %c0_11] : memref<4x128xf32, #tpu.memory_space<vmem>>, vector<4x128xf32>
    %cst_12 = arith.constant dense<0.000000e+00> : vector<4x128xf32>
    %16 = tpu.matmul %14, %15, %cst_12 {dimension_numbers = #tpu.dot_dimension_numbers<[1], [0], [0], [1], [0, 0, 1, 1], [], []>, precision = #tpu.contract_precision<fp32>} : vector<4x4xf32>, vector<4x128xf32>, vector<4x128xf32> -> vector<4x128xf32>
    %17 = arith.mulf %7, %16 : vector<4x128xf32>
    %c0_13 = arith.constant 0 : index
    %c0_14 = arith.constant 0 : index
    %18 = vector.load %arg4[%c0_13, %c0_14] : memref<1x128xf32, #tpu.memory_space<vmem>>, vector<1x128xf32>
    %19 = vector.broadcast %18 : vector<1x128xf32> to vector<4x128xf32>
    %20 = arith.mulf %17, %19 : vector<4x128xf32>
    %c0_15 = arith.constant 0 : index
    %c0_16 = arith.constant 0 : index
    %21 = vector.load %arg5[%c0_15, %c0_16] : memref<1x128xf32, #tpu.memory_space<vmem>>, vector<1x128xf32>
    %22 = vector.broadcast %21 : vector<1x128xf32> to vector<4x128xf32>
    %23 = arith.addf %20, %22 : vector<4x128xf32>
    %c0_17 = arith.constant 0 : index
    %c0_18 = arith.constant 0 : index
    %24 = vector.load %arg6[%c0_17, %c0_18] : memref<4x128xf32, #tpu.memory_space<vmem>>, vector<4x128xf32>
    tpu.vector_store %arg6[%c0_17, %c0_18], %23 {strides = array<i32>} : memref<4x128xf32, #tpu.memory_space<vmem>>, vector<4x128xf32>,
    return
  }
  func.func @transform_0(%arg0: i32) -> (i32, i32) {
    %c0_i32 = arith.constant 0 : i32
    %c0_i32_0 = arith.constant 0 : i32
    return %arg0, %c0_i32 : i32, i32
  }
  func.func @transform_1(%arg0: i32) -> (i32, i32) {
    %c0_i32 = arith.constant 0 : i32
    %c0_i32_0 = arith.constant 0 : i32
    %c0_i32_1 = arith.constant 0 : i32
    return %c0_i32, %c0_i32_0 : i32, i32
  }
  func.func @transform_2(%arg0: i32) -> (i32, i32) {
    %c0_i32 = arith.constant 0 : i32
    %c0_i32_0 = arith.constant 0 : i32
    %c0_i32_1 = arith.constant 0 : i32
    return %c0_i32, %c0_i32_0 : i32, i32
  }
  func.func @transform_3(%arg0: i32) -> (i32, i32) {
    %c0_i32 = arith.constant 0 : i32
    %c0_i32_0 = arith.constant 0 : i32
    %c0_i32_1 = arith.constant 0 : i32
    return %c0_i32, %c0_i32_0 : i32, i32
  }
  func.func @transform_4(%arg0: i32) -> (i32, i32) {
    %c0_i32 = arith.constant 0 : i32
    %c0_i32_0 = arith.constant 0 : i32
    %c0_i32_1 = arith.constant 0 : i32
    return %c0_i32, %c0_i32_0 : i32, i32
  }
  func.func @transform_5(%arg0: i32) -> (i32, i32) {
    %c0_i32 = arith.constant 0 : i32
    %c0_i32_0 = arith.constant 0 : i32
    return %arg0, %c0_i32 : i32, i32
  }
}

module attributes {stable_mosaic.version = 11 : i64} {
  func.func @kernel(%arg0: i32, %arg1: memref<8x32xf32, #tpu.memory_space<vmem>>, %arg2: memref<1x32xf32, #tpu.memory_space<vmem>>, %arg3: memref<1x32xf32, #tpu.memory_space<vmem>>, %arg4: memref<8x32xf32, #tpu.memory_space<vmem>>) attributes {dimension_semantics = [#tpu.dimension_semantics<parallel>], iteration_bounds = array<i64: 2>, scalar_prefetch = 0 : i64, scratch_operands = 0 : i64, tpu.core_type = #tpu.core_type<tc>, window_params = [{transform_indices = @transform_0, window_bounds = array<i64: 8, 32>}, {pipeline_mode = #tpu.pipeline_mode<synchronous>, transform_indices = @transform_1, window_bounds = array<i64: 1, 32>}, {pipeline_mode = #tpu.pipeline_mode<synchronous>, transform_indices = @transform_2, window_bounds = array<i64: 1, 32>}, {transform_indices = @transform_3, window_bounds = array<i64: 8, 32>}]} {
    %c0 = arith.constant 0 : index
    %c0_0 = arith.constant 0 : index
    %0 = vector.load %arg1[%c0, %c0_0] : memref<8x32xf32, #tpu.memory_space<vmem>>, vector<8x32xf32>
    %cst = arith.constant dense<0.000000e+00> : vector<8xf32>
    %1 = vector.multi_reduction <add>, %0, %cst [1] : vector<8x32xf32> to vector<8xf32>
    %2 = vector.shape_cast %1 : vector<8xf32> to vector<8x1xf32>
    %cst_1 = arith.constant 3.125000e-02 : f32
    %3 = vector.broadcast %cst_1 : f32 to vector<8x1xf32>
    %4 = arith.mulf %2, %3 : vector<8x1xf32>
    %5 = vector.broadcast %4 : vector<8x1xf32> to vector<8x32xf32>
    %6 = arith.subf %0, %5 : vector<8x32xf32>
    %7 = arith.mulf %6, %6 : vector<8x32xf32>
    %cst_2 = arith.constant dense<0.000000e+00> : vector<8xf32>
    %8 = vector.multi_reduction <add>, %7, %cst_2 [1] : vector<8x32xf32> to vector<8xf32>
    %9 = vector.shape_cast %8 : vector<8xf32> to vector<8x1xf32>
    %cst_3 = arith.constant 3.125000e-02 : f32
    %10 = vector.broadcast %cst_3 : f32 to vector<8x1xf32>
    %11 = arith.mulf %9, %10 : vector<8x1xf32>
    %cst_4 = arith.constant 9.99999974E-6 : f32
    %12 = vector.broadcast %cst_4 : f32 to vector<8x1xf32>
    %13 = arith.addf %11, %12 : vector<8x1xf32>
    %14 = math.rsqrt %13 : vector<8x1xf32>
    %15 = vector.broadcast %14 : vector<8x1xf32> to vector<8x32xf32>
    %16 = arith.mulf %6, %15 : vector<8x32xf32>
    %c0_5 = arith.constant 0 : index
    %c0_6 = arith.constant 0 : index
    %17 = vector.load %arg2[%c0_5, %c0_6] : memref<1x32xf32, #tpu.memory_space<vmem>>, vector<1x32xf32>
    %18 = vector.broadcast %17 : vector<1x32xf32> to vector<8x32xf32>
    %19 = arith.mulf %16, %18 : vector<8x32xf32>
    %c0_7 = arith.constant 0 : index
    %c0_8 = arith.constant 0 : index
    %20 = vector.load %arg3[%c0_7, %c0_8] : memref<1x32xf32, #tpu.memory_space<vmem>>, vector<1x32xf32>
    %21 = vector.broadcast %20 : vector<1x32xf32> to vector<8x32xf32>
    %22 = arith.addf %19, %21 : vector<8x32xf32>
    %c0_9 = arith.constant 0 : index
    %c0_10 = arith.constant 0 : index
    %23 = vector.load %arg4[%c0_9, %c0_10] : memref<8x32xf32, #tpu.memory_space<vmem>>, vector<8x32xf32>
    tpu.vector_store %arg4[%c0_9, %c0_10], %22 {strides = array<i32>} : memref<8x32xf32, #tpu.memory_space<vmem>>, vector<8x32xf32>,
    return
  }
  func.func @transform_0(%arg0: i32) -> (i32, i32) {
    %c0_i32 = arith.constant 0 : i32
    %c0_i32_0 = arith.constant 0 : i32
    return %arg0, %c0_i32 : i32, i32
  }
  func.func @transform_1(%arg0: i32) -> (i32, i32) {
    %c0_i32 = arith.constant 0 : i32
    %c0_i32_0 = arith.constant 0 : i32
    %c0_i32_1 = arith.constant 0 : i32
    return %c0_i32, %c0_i32_0 : i32, i32
  }
  func.func @transform_2(%arg0: i32) -> (i32, i32) {
    %c0_i32 = arith.constant 0 : i32
    %c0_i32_0 = arith.constant 0 : i32
    %c0_i32_1 = arith.constant 0 : i32
    return %c0_i32, %c0_i32_0 : i32, i32
  }
  func.func @transform_3(%arg0: i32) -> (i32, i32) {
    %c0_i32 = arith.constant 0 : i32
    %c0_i32_0 = arith.constant 0 : i32
    return %arg0, %c0_i32 : i32, i32
  }
}

</mosaic_0001>

<bundles_post_ra>
// kernel: tpu_custom_call.1
= control target key start
LH: loop header
LB: loop body
LE: loop exit
PB: predicated region body
PF: predicated region fallthrough
CT: control target
= control target key end

     0   :  { %s1614_s0 = inlined_call_operand.vmem [shape: f32[4,128], index: 0, kind: input, shape index: {}]   ;;  %s1615_s1 = inlined_call_operand.vmem [shape: f32[128,4], index: 1, kind: input, shape index: {}]   ;;  %s1616_s2 = inlined_call_operand.vmem [shape: f32[4,128], index: 2, kind: input, shape index: {}]   ;;  %s1617_s3 = inlined_call_operand.vmem [shape: f32[1,128], index: 3, kind: input, shape index: {}]   ;;  %s1618_s4 = inlined_call_operand.vmem [shape: f32[1,128], index: 4, kind: input, shape index: {}]   ;;  %s1619_s5 = inlined_call_operand.hbm [shape: f32[4,128], index: 5, kind: output, shape index: {}]  }
   0x1   :  { %v37_v0 = vld [vmem:[%s1615_s1 + $0x78] sm:$0xff]  ;;  %v36_v1 = vld [vmem:[%s1615_s1 + $0x70] sm:$0xff]  ;;  %v35_v2 = vld [vmem:[%s1615_s1 + $0x68] sm:$0xff] }
   0x2   :  { %v1138_v3 = vand.u32 4294901760, %v37_v0  ;;  %v1140_v4 = vand.u32 4294901760, %v36_v1  ;;  %v1142_v5 = vand.u32 4294901760, %v35_v2  ;;  %v34_v6 = vld [vmem:[%s1615_s1 + $0x60] sm:$0xff]  ;;  %v33_v7 = vld [vmem:[%s1615_s1 + $0x58] sm:$0xff]  ;;  %v32_v8 = vld [vmem:[%s1615_s1 + $0x50] sm:$0xff] }
   0x3   :  { %v1153_v9 = vand.u32 4294901760, %v34_v6  ;;  %v1155_v10 = vand.u32 4294901760, %v33_v7  ;;  %v1157_v11 = vand.u32 4294901760, %v32_v8  ;;  %v31_v12 = vld [vmem:[%s1615_s1 + $0x48] sm:$0xff]  ;;  %v30_v13 = vld [vmem:[%s1615_s1 + $0x40] sm:$0xff]  ;;  %v29_v18 = vld [vmem:[%s1615_s1 + $0x38] sm:$0xff] }
   0x4   :  { %39 = vmatpush.msra.mxu0 %v1138_v3  ;;  %v1167_v14 = vsub.f32 %v37_v0, %v1138_v3  ;;  %v1170_v15 = vsub.f32 %v36_v1, %v1140_v4  ;;  %v1173_v16 = vsub.f32 %v35_v2, %v1142_v5  ;;  %v1175_v17 = vand.u32 4294901760, %v31_v12  ;;  %235 = vmatpush.msra.mxu3 %v1138_v3  ;;  %v28_v26 = vld [vmem:[%s1615_s1 + $0x30] sm:$0xff] }
   0x5   :  { %v1182_v19 = vsub.f32 %v34_v6, %v1153_v9  ;;  %v1185_v20 = vsub.f32 %v33_v7, %v1155_v10  ;;  %v1188_v21 = vsub.f32 %v32_v8, %v1157_v11  ;;  %v1200_v25 = vand.u32 4294901760, %v30_v13 }
   0x6   :  { %41 = vmatpush.msra.mxu0 %v1140_v4  ;;  %v1192_v22 = vand.u32 4294901760, %v1167_v14  ;;  %v1195_v23 = vand.u32 4294901760, %v1170_v15  ;;  %v1198_v24 = vand.u32 4294901760, %v1173_v16  ;;  %182 = vmatpush.msra.mxu2 %v1167_v14  ;;  %v1209_v28 = vand.u32 4294901760, %v29_v18 }
   0x7   :  { %v1207_v27 = vand.u32 4294901760, %v1182_v19  ;;  %v1212_v29 = vsub.f32 %v31_v12, %v1175_v17  ;;  %237 = vmatpush.msra.mxu3 %v1140_v4 }
   0x8   :  { %10 = vsyncpa [#allocation3], 0  ;;  %43 = vmatpush.msra.mxu0 %v1142_v5  ;;  %v82_v30 = vsub.f32 %v1167_v14, %v1192_v22  ;;  %v88_v31 = vsub.f32 %v1170_v15, %v1195_v23  ;;  %v94_v32 = vsub.f32 %v1173_v16, %v1198_v24  ;;  %v1223_v33 = vand.u32 4294901760, %v1185_v20  ;;  %185 = vmatpush.msra.mxu2 %v1170_v15  ;;  %v27_v36 = vld [vmem:[%s1615_s1 + $0x28] sm:$0xff]  ;;  %v26_v42 = vld [vmem:[%s1615_s1 + $0x20] sm:$0xff]  ;;  %s1098_s30 = smov [#allocation2]  }
   0x9   :  { %v1227_v34 = vand.u32 4294901760, %v1188_v21  ;;  %v1229_v35 = vand.u32 4294901760, %v28_v26  ;;  %239 = vmatpush.msra.mxu3 %v1142_v5  ;;  %v100_v39 = vsub.f32 %v1182_v19, %v1207_v27  ;;  %v1243_v40 = vsub.f32 %v30_v13, %v1200_v25  ;;  %v25_v47 = vld [vmem:[%s1615_s1 + $0x18] sm:$0xff]  ;;  %v24_v55 = vld [vmem:[%s1615_s1 + $0x10] sm:$0xff]  ;;  %v23_v60 = vld [vmem:[%s1615_s1 + $0x8] sm:$0xff]  ;;  %s1056_s6 = sshll.u32 %s1098_s30, 4  ;;  %s1057_s6 = int_to_ptr.vmem [resolvable:$true] %s1056_s6 }
   0xa   :  { %v1235_v37 = vand.u32 4294901760, %v82_v30  ;;  %45 = vmatpush.msra.mxu0 %v1153_v9  ;;  %v1238_v38 = vand.u32 4294901760, %v88_v31  ;;  %188 = vmatpush.msra.mxu2 %v1173_v16  ;;  %v1247_v41 = vand.u32 4294901760, %v1212_v29  ;;  %v1255_v43 = vand.u32 4294901760, %v94_v32  ;;  %v22_v1 = vld [vmem:[%s1615_s1] sm:$0xff]  ;;  %s1058_s9 = sshll.u32 %s1619_s5, 4  ;;  %s1059_s9 = int_to_ptr.hbm [resolvable:$true] %s1058_s9 }
   0xb   :  { %241 = vmatpush.msra.mxu3 %v1153_v9  ;;  %v106_v44 = vsub.f32 %v1185_v20, %v1223_v33  ;;  %v1259_v45 = vand.u32 4294901760, %v27_v36  ;;  %v1262_v46 = vsub.f32 %v29_v18, %v1209_v28  ;;  %v112_v48 = vsub.f32 %v1188_v21, %v1227_v34  ;;  %v1334_v7 = vld [vmem:[%s1614_s0] sm:$0xf] }
   0xc   :  { %84 = vmatpush.msra.mxu1 %v1235_v37  ;;  %47 = vmatpush.msra.mxu0 %v1155_v10  ;;  %v1273_v49 = vand.u32 4294901760, %v100_v39  ;;  %v1276_v50 = vand.u32 4294901760, %v1243_v40  ;;  %v1278_v51 = vand.u32 4294901760, %v26_v42  ;;  %v1281_v52 = vsub.f32 %v28_v26, %v1229_v35  ;;  %1631 = vst [vmem:[#allocation8_spill] sm:$0xff] %v1334_v7 }
   0xd   :  { %191 = vmatpush.msra.mxu2 %v1182_v19  ;;  %243 = vmatpush.msra.mxu3 %v1155_v10  ;;  %v118_v53 = vsub.f32 %v1212_v29, %v1247_v41  ;;  %v1285_v54 = vand.u32 4294901760, %v25_v47  ;;  %v1294_v56 = vand.u32 4294901760, %v106_v44  ;;  %v1297_v57 = vand.u32 4294901760, %v1262_v46 }
   0xe   :  { %90 = vmatpush.msra.mxu1 %v1238_v38  ;;  %49 = vmatpush.msra.mxu0 %v1157_v11  ;;  %v1300_v58 = vsub.f32 %v27_v36, %v1259_v45  ;;  %v1302_v59 = vand.u32 4294901760, %v112_v48  ;;  %v124_v61 = vsub.f32 %v1243_v40, %v1276_v50  ;;  %v1314_v62 = vand.u32 4294901760, %v1281_v52 }
   0xf   :  { %194 = vmatpush.msra.mxu2 %v1185_v20  ;;  %245 = vmatpush.msra.mxu3 %v1157_v11  ;;  %1628 = vst [vmem:[#allocation5_spill] sm:$0xff] %v1294_v56  ;;  %v1316_v63 = vand.u32 4294901760, %v24_v55  ;;  %v1319_v0 = vsub.f32 %v26_v42, %v1278_v51  ;;  %v1324_v2 = vand.u32 4294901760, %v118_v53  ;;  %v1327_v6 = vsub.f32 %v25_v47, %v1285_v54 }
  0x10   :  { %96 = vmatpush.msra.mxu1 %v1255_v43  ;;  %51 = vmatpush.msra.mxu0 %v1175_v17  ;;  %1629 = vst [vmem:[#allocation6_spill] sm:$0xff] %v1302_v59  ;;  %v130_v8 = vsub.f32 %v1262_v46, %v1297_v57  ;;  %v1341_v12 = vand.u32 4294901760, %v1300_v58  ;;  %v1343_v13 = vand.u32 4294901760, %v23_v60  ;;  %v1346_v18 = vand.u32 4294901760, %v1334_v7 }
  0x11   :  { %197 = vmatpush.msra.mxu2 %v1188_v21  ;;  %247 = vmatpush.msra.mxu3 %v1175_v17  ;;  %1630 = vst [vmem:[#allocation7_spill] sm:$0xff] %v1324_v2  ;;  %v1348_v26 = vand.u32 4294901760, %v22_v1  ;;  %v1354_v30 = vand.u32 4294901760, %v124_v61  ;;  %v136_v31 = vsub.f32 %v1281_v52, %v1314_v62  ;;  %v1359_v32 = vand.u32 4294901760, %v1319_v0 }
  0x12   :  { %102 = vmatpush.msra.mxu1 %v1273_v49  ;;  %53 = vmatpush.msra.mxu0 %v1200_v25  ;;  %v1362_v36 = vsub.f32 %v24_v55, %v1316_v63  ;;  %v1365_v39 = vand.u32 4294901760, %v1327_v6  ;;  %v1371_v42 = vand.u32 4294901760, %v130_v8  ;;  %v142_v44 = vsub.f32 %v1300_v58, %v1341_v12 }
  0x13   :  { %200 = vmatpush.msra.mxu2 %v1212_v29  ;;  %249 = vmatpush.msra.mxu3 %v1200_v25  ;;  %1632 = vst [vmem:[#allocation9_spill] sm:$0xff] %v1354_v30  ;;  %v1376_v47 = vsub.f32 %v23_v60, %v1343_v13  ;;  %v71_v48 = vsub.f32 %v1334_v7, %v1346_v18  ;;  %v1384_v53 = vand.u32 4294901760, %v136_v31  ;;  %vm385_vm0 = vcmask 1043456  }
  0x14   :  { %108 = vmatpush.msra.mxu1 %v1294_v56  ;;  %55 = vmatpush.msra.mxu0 %v1209_v28  ;;  %1633 = vst [vmem:[#allocation10_spill] sm:$0xff] %v1371_v42  ;;  %v148_v55 = vsub.f32 %v1319_v0, %v1359_v32  ;;  %v1389_v61 = vand.u32 4294901760, %v1362_v36  ;;  %v1392_v60 = vsub.f32 %v22_v1, %v1348_v26  ;;  %v1398_v8 = vand.u32 4294901760, %v142_v44 }
  0x15   :  { %203 = vmatpush.msra.mxu2 %v1243_v40  ;;  %251 = vmatpush.msra.mxu3 %v1209_v28  ;;  %1634 = vst [vmem:[#allocation11_spill] sm:$0xff] %v1384_v53  ;;  %v154_v31 = vsub.f32 %v1327_v6, %v1365_v39  ;;  %v1403_v7 = vand.u32 4294901760, %v1376_v47  ;;  %vm381_vm1 = vcmask 31744  }
  0x16   :  { %114 = vmatpush.msra.mxu1 %v1302_v59  ;;  %57 = vmatpush.msra.mxu0 %v1229_v35  ;;  %1635 = vst [vmem:[#allocation12_spill] sm:$0xff] %v1398_v8  ;;  %v1409_v1 = vand.u32 4294901760, %v148_v55  ;;  %v160_v44 = vsub.f32 %v1362_v36, %v1389_v61 }
  0x17   :  { %206 = vmatpush.msra.mxu2 %v1262_v46  ;;  %253 = vmatpush.msra.mxu3 %v1229_v35  ;;  %v166_v55 = vsub.f32 %v1376_v47, %v1403_v7 }
  0x18   :  { %120 = vmatpush.msra.mxu1 %v1324_v2  ;;  %59 = vmatpush.msra.mxu0 %v1259_v45  ;;  %v1420_v2 = vand.u32 4294901760, %v154_v31  ;;  %v1428_v59 = vand.u32 4294901760, %v160_v44 }
  0x19   :  { %209 = vmatpush.msra.mxu2 %v1281_v52  ;;  %255 = vmatpush.msra.mxu3 %v1259_v45  ;;  %v1435_v31 = vand.u32 4294901760, %v166_v55 }
  0x1a   :  { %126 = vmatpush.msra.mxu1 %v1354_v30  ;;  %61 = vmatpush.msra.mxu0 %v1278_v51  ;;  %v72_v30 = vand.u32 4294901760, %v71_v48 }
  0x1b   :  { %212 = vmatpush.msra.mxu2 %v1300_v58  ;;  %257 = vmatpush.msra.mxu3 %v1278_v51 }
  0x1c   :  { %132 = vmatpush.msra.mxu1 %v1371_v42  ;;  %63 = vmatpush.msra.mxu0 %v1285_v54  ;;  %v1414_v42 = vand.u32 4294901760, %v1392_v60 }
  0x1d   :  { %215 = vmatpush.msra.mxu2 %v1319_v0  ;;  %259 = vmatpush.msra.mxu3 %v1285_v54 }
  0x1e   :  { %138 = vmatpush.msra.mxu1 %v1384_v53  ;;  %65 = vmatpush.msra.mxu0 %v1316_v63  ;;  %v73_v53 = vsub.f32 %v71_v48, %v72_v30 }
  0x1f   :  { %218 = vmatpush.msra.mxu2 %v1327_v6  ;;  %261 = vmatpush.msra.mxu3 %v1316_v63 }
  0x20   :  { %144 = vmatpush.msra.mxu1 %v1398_v8  ;;  %67 = vmatpush.msra.mxu0 %v1343_v13  ;;  %v172_v8 = vsub.f32 %v1392_v60, %v1414_v42  ;;  %v74_v56 = vand.u32 4294901760, %v73_v53 }
  0x21   :  { %221 = vmatpush.msra.mxu2 %v1362_v36  ;;  %263 = vmatpush.msra.mxu3 %v1343_v13 }
  0x22   :  { %150 = vmatpush.msra.mxu1 %v1409_v1  ;;  %69 = vmatpush.msra.mxu0 %v1348_v26  ;;  %v1441_v44 = vand.u32 4294901760, %v172_v8 }
  0x23   :  { %224 = vmatpush.msra.mxu2 %v1376_v47  ;;  %265 = vmatpush.msra.mxu3 %v1348_v26 }
  0x24   :  { %276 = vmatpush.msrb.mxu0 %v1192_v22  ;;  %156 = vmatpush.msra.mxu1 %v1420_v2 }
  0x25   :  { %227 = vmatpush.msra.mxu2 %v1392_v60  ;;  %269 = vmatmul.f32.vlgmr.msra.gmra.mxu3 %v72_v30 }
  0x26   :  { %280 = vmatpush.msrb.mxu0 %v1195_v23  ;;  %162 = vmatpush.msra.mxu1 %v1428_v59 }
  0x27   :  { %230 = vmatmul.f32.vlgmr.msra.gmra.mxu2 %v71_v48  ;;  %75 = vmatmul.f32.vlgmr.msra.gmra.mxu0 %v74_v56 }
  0x28   :  { %284 = vmatpush.msrb.mxu0 %v1198_v24  ;;  %168 = vmatpush.msra.mxu1 %v1435_v31 }
  0x2a   :  { %288 = vmatpush.msrb.mxu0 %v1207_v27  ;;  %174 = vmatpush.msra.mxu1 %v1441_v44 }
  0x2b   :  { %176 = vmatmul.f32.vlgmr.msra.gmra.mxu1 %v1346_v18 }
  0x2c   :  { %343 = vmatpush.msrb.mxu1 %v1138_v3  ;;  %292 = vmatpush.msrb.mxu0 %v1223_v33 }
  0x2e   :  { %345 = vmatpush.msrb.mxu1 %v1140_v4  ;;  %296 = vmatpush.msrb.mxu0 %v1227_v34 }
  0x30   :  { %347 = vmatpush.msrb.mxu1 %v1142_v5  ;;  %300 = vmatpush.msrb.mxu0 %v1247_v41 }
  0x32   :  { %349 = vmatpush.msrb.mxu1 %v1153_v9  ;;  %304 = vmatpush.msrb.mxu0 %v1276_v50 }
  0x34   :  { %351 = vmatpush.msrb.mxu1 %v1155_v10  ;;  %308 = vmatpush.msrb.mxu0 %v1297_v57 }
  0x36   :  { %353 = vmatpush.msrb.mxu1 %v1157_v11  ;;  %312 = vmatpush.msrb.mxu0 %v1314_v62 }
  0x38   :  { %355 = vmatpush.msrb.mxu1 %v1175_v17  ;;  %316 = vmatpush.msrb.mxu0 %v1341_v12 }
  0x3a   :  { %357 = vmatpush.msrb.mxu1 %v1200_v25  ;;  %320 = vmatpush.msrb.mxu0 %v1359_v32 }
  0x3c   :  { %359 = vmatpush.msrb.mxu1 %v1209_v28  ;;  %324 = vmatpush.msrb.mxu0 %v1365_v39 }
  0x3e   :  { %361 = vmatpush.msrb.mxu1 %v1229_v35  ;;  %328 = vmatpush.msrb.mxu0 %v1389_v61 }
  0x40   :  { %363 = vmatpush.msrb.mxu1 %v1259_v45  ;;  %332 = vmatpush.msrb.mxu0 %v1403_v7 }
  0x42   :  { %365 = vmatpush.msrb.mxu1 %v1278_v51  ;;  %336 = vmatpush.msrb.mxu0 %v1414_v42 }
  0x43   :  { %338 = vmatmul.f32.vlgmr.msrb.gmra.mxu0 %v1346_v18 }
  0x44   :  { %367 = vmatpush.msrb.mxu1 %v1285_v54  ;;  %681 = vmatpush.msra.mxu0 %v1167_v14  ;;  %v380_v14 = vld [vmem:[%s1616_s2] sm:$0xf] }
  0x46   :  { %369 = vmatpush.msrb.mxu1 %v1316_v63  ;;  %684 = vmatpush.msra.mxu0 %v1170_v15  ;;  %v387_v15 = vsel %vm385_vm0, %v380_v14, 0 }
  0x48   :  { %371 = vmatpush.msrb.mxu1 %v1343_v13  ;;  %687 = vmatpush.msra.mxu0 %v1173_v16  ;;  %v1513_v16 = vand.u32 4294901760, %v387_v15 }
  0x4a   :  { %373 = vmatpush.msrb.mxu1 %v1348_v26  ;;  %690 = vmatpush.msra.mxu0 %v1182_v19  ;;  %v1516_v19 = vsub.f32 %v387_v15, %v1513_v16 }
  0x4b   :  { %375 = vmatmul.f32.vlgmr.msrb.gmra.mxu1 %v1346_v18  ;;  %405 = vmatpush.msrb.mxu2 %v1513_v16 }
  0x4c   :  { %734 = vmatpush.msra.mxu1 %v1138_v3  ;;  %693 = vmatpush.msra.mxu0 %v1185_v20  ;;  %v1521_v20 = vand.u32 4294901760, %v1516_v19 }
  0x4d   :  { %458 = vmatpush.msra.mxu2 %v1516_v19 }
  0x4e   :  { %736 = vmatpush.msra.mxu1 %v1140_v4  ;;  %696 = vmatpush.msra.mxu0 %v1188_v21  ;;  %v433_v21 = vsub.f32 %v1516_v19, %v1521_v20 }
  0x50   :  { %738 = vmatpush.msra.mxu1 %v1142_v5  ;;  %699 = vmatpush.msra.mxu0 %v1212_v29  ;;  %v434_v29 = vand.u32 4294901760, %v433_v21  ;;  %v1636_v21 = vld [vmem:[#allocation5_spill] sm:$0xff] }
  0x52   :  { %740 = vmatpush.msra.mxu1 %v1153_v9  ;;  %702 = vmatpush.msra.mxu0 %v1243_v40 }
  0x53   :  { %435 = vmatpush.msrb.mxu3 %v434_v29 }
  0x54   :  { %742 = vmatpush.msra.mxu1 %v1155_v10  ;;  %705 = vmatpush.msra.mxu0 %v1262_v46 }
  0x55   :  { %481 = vmatpush.msra.mxu3 %v1513_v16 }
  0x56   :  { %744 = vmatpush.msra.mxu1 %v1157_v11  ;;  %708 = vmatpush.msra.mxu0 %v1281_v52 }
  0x58   :  { %746 = vmatpush.msra.mxu1 %v1175_v17  ;;  %711 = vmatpush.msra.mxu0 %v1300_v58 }
  0x5a   :  { %748 = vmatpush.msra.mxu1 %v1200_v25  ;;  %714 = vmatpush.msra.mxu0 %v1319_v0 }
  0x5c   :  { %750 = vmatpush.msra.mxu1 %v1209_v28  ;;  %717 = vmatpush.msra.mxu0 %v1327_v6 }
  0x5e   :  { %752 = vmatpush.msra.mxu1 %v1229_v35  ;;  %720 = vmatpush.msra.mxu0 %v1362_v36 }
  0x60   :  { %754 = vmatpush.msra.mxu1 %v1259_v45  ;;  %723 = vmatpush.msra.mxu0 %v1376_v47 }
  0x62   :  { %756 = vmatpush.msra.mxu1 %v1278_v51  ;;  %726 = vmatpush.msra.mxu0 %v1392_v60 }
  0x64   :  { %758 = vmatpush.msra.mxu1 %v1285_v54  ;;  %909 = vmatpush.msrb.mxu0 %v1513_v16 }
  0x66   :  { %760 = vmatpush.msra.mxu1 %v1316_v63 }
  0x68   :  { %762 = vmatpush.msra.mxu1 %v1343_v13 }
  0x6a   :  { %764 = vmatpush.msra.mxu1 %v1348_v26 }
  0x6c   :  { %939 = vmatpush.msrb.mxu1 %v434_v29  ;;  %v1637_v29 = vld [vmem:[#allocation6_spill] sm:$0xff] }
  0xa4   :  { %v76_v46 = vpop.f32.mrf.mxu0 }
  0xa8   :  { %v177_v40 = vpop.f32.mrf.mxu1  ;;  %v270_v0 = vpop.f32.mrf.mxu3 }
  0xa9   :  { %v178_v52 = vadd.f32 %v177_v40, %v76_v46  ;;  %v1638_v40 = vld [vmem:[#allocation7_spill] sm:$0xff] }
  0xaa   :  { %v231_v56 = vpop.f32.mrf.mxu2 }
  0xab   :  { %v232_v58 = vadd.f32 %v231_v56, %v178_v52 }
  0xad   :  { %v271_v6 = vadd.f32 %v270_v0, %v232_v58 }
  0xc0   :  { %v339_v18 = vpop.f32.mrf.mxu0 }
  0xc1   :  { %v340_v30 = vadd.f32 %v339_v18, %v271_v6 }
  0xc8   :  { %v376_v36 = vpop.f32.mrf.mxu1 }
  0xc9   :  { %v377_v47 = vadd.f32 %v376_v36, %v340_v30 }
  0xcb   :  { %v379_v48 = vmul.f32 0.03125, %v377_v47 }
  0xcd   :  { %v383_v53 = vsel %vm381_vm1, %v379_v48, 0 }
  0xce   :  { %v406_v60 = vand.u32 4294901760, %v383_v53 }
  0xd0   :  { %v407_v8 = vsub.f32 %v383_v53, %v406_v60  ;;  %437 = vmatmul.f32.vlgmr.msrb.gmra.mxu3 %v406_v60 }
  0xd1   :  { %529 = vmatpush.msrb.mxu3 %v1513_v16 }
  0xd2   :  { %v408_v55 = vand.u32 4294901760, %v407_v8 }
  0xd4   :  { %v409_v14 = vsub.f32 %v407_v8, %v408_v55 }
  0xd6   :  { %v410_v15 = vand.u32 4294901760, %v409_v14 }
  0xd8   :  { %411 = vmatmul.f32.vlgmr.msrb.gmra.mxu2 %v410_v15  ;;  %485 = vmatmul.f32.vlgmr.msra.gmra.mxu3 %v408_v55 }
  0xd9   :  { %507 = vmatpush.msrb.mxu2 %v1521_v20  ;;  %583 = vmatpush.msra.mxu3 %v1235_v37  ;;  %v1639_v37 = vld [vmem:[#allocation9_spill] sm:$0xff] }
  0xdb   :  { %589 = vmatpush.msra.mxu3 %v1238_v38  ;;  %v1640_v38 = vld [vmem:[#allocation10_spill] sm:$0xff] }
  0xdd   :  { %595 = vmatpush.msra.mxu3 %v1255_v43  ;;  %v1641_v43 = vld [vmem:[#allocation11_spill] sm:$0xff] }
  0xdf   :  { %601 = vmatpush.msra.mxu3 %v1273_v49  ;;  %v1642_v49 = vld [vmem:[#allocation12_spill] sm:$0xff] }
  0xe0   :  { %461 = vmatmul.f32.vlgmr.msra.gmra.mxu2 %v407_v8  ;;  %531 = vmatmul.f32.vlgmr.msrb.gmra.mxu3 %v406_v60 }
  0xe1   :  { %538 = vmatpush.msra.mxu2 %v1138_v3  ;;  %607 = vmatpush.msra.mxu3 %v1636_v21  ;;  %v1068_v21 = vld [vmem:[%s1617_s3] ss:$0 sm:$0xff] }
  0xe3   :  { %540 = vmatpush.msra.mxu2 %v1140_v4  ;;  %613 = vmatpush.msra.mxu3 %v1637_v29  ;;  %v1069_v29 = vld [vmem:[%s1618_s4] ss:$0 sm:$0xff] }
  0xe5   :  { %542 = vmatpush.msra.mxu2 %v1142_v5  ;;  %619 = vmatpush.msra.mxu3 %v1638_v40 }
  0xe7   :  { %544 = vmatpush.msra.mxu2 %v1153_v9  ;;  %625 = vmatpush.msra.mxu3 %v1639_v37 }
  0xe8   :  { %509 = vmatmul.f32.vlgmr.msrb.gmra.mxu2 %v406_v60 }
  0xe9   :  { %546 = vmatpush.msra.mxu2 %v1155_v10  ;;  %631 = vmatpush.msra.mxu3 %v1640_v38 }
  0xeb   :  { %548 = vmatpush.msra.mxu2 %v1157_v11  ;;  %637 = vmatpush.msra.mxu3 %v1641_v43 }
  0xed   :  { %550 = vmatpush.msra.mxu2 %v1175_v17  ;;  %643 = vmatpush.msra.mxu3 %v1642_v49 }
  0xef   :  { %552 = vmatpush.msra.mxu2 %v1200_v25  ;;  %649 = vmatpush.msra.mxu3 %v1409_v1 }
  0xf1   :  { %554 = vmatpush.msra.mxu2 %v1209_v28  ;;  %655 = vmatpush.msra.mxu3 %v1420_v2 }
  0xf3   :  { %556 = vmatpush.msra.mxu2 %v1229_v35  ;;  %661 = vmatpush.msra.mxu3 %v1428_v59 }
  0xf5   :  { %558 = vmatpush.msra.mxu2 %v1259_v45  ;;  %667 = vmatpush.msra.mxu3 %v1435_v31 }
  0xf7   :  { %560 = vmatpush.msra.mxu2 %v1278_v51  ;;  %673 = vmatpush.msra.mxu3 %v1441_v44 }
  0xf9   :  { %842 = vmatpush.msrb.mxu3 %v1138_v3  ;;  %562 = vmatpush.msra.mxu2 %v1285_v54 }
  0xfb   :  { %844 = vmatpush.msrb.mxu3 %v1140_v4  ;;  %564 = vmatpush.msra.mxu2 %v1316_v63 }
  0xfd   :  { %846 = vmatpush.msrb.mxu3 %v1142_v5  ;;  %566 = vmatpush.msra.mxu2 %v1343_v13 }
  0xff   :  { %848 = vmatpush.msrb.mxu3 %v1153_v9  ;;  %568 = vmatpush.msra.mxu2 %v1348_v26 }
 0x101   :  { %775 = vmatpush.msrb.mxu2 %v1192_v22  ;;  %850 = vmatpush.msrb.mxu3 %v1155_v10 }
 0x103   :  { %779 = vmatpush.msrb.mxu2 %v1195_v23  ;;  %852 = vmatpush.msrb.mxu3 %v1157_v11 }
 0x105   :  { %783 = vmatpush.msrb.mxu2 %v1198_v24  ;;  %854 = vmatpush.msrb.mxu3 %v1175_v17 }
 0x107   :  { %787 = vmatpush.msrb.mxu2 %v1207_v27  ;;  %856 = vmatpush.msrb.mxu3 %v1200_v25  ;;  %v1643_v27 = vld [vmem:[#allocation8_spill] sm:$0xff] }
 0x109   :  { %791 = vmatpush.msrb.mxu2 %v1223_v33  ;;  %858 = vmatpush.msrb.mxu3 %v1209_v28 }
 0x10b   :  { %795 = vmatpush.msrb.mxu2 %v1227_v34  ;;  %860 = vmatpush.msrb.mxu3 %v1229_v35 }
 0x10d   :  { %799 = vmatpush.msrb.mxu2 %v1247_v41  ;;  %862 = vmatpush.msrb.mxu3 %v1259_v45 }
 0x10f   :  { %803 = vmatpush.msrb.mxu2 %v1276_v50  ;;  %864 = vmatpush.msrb.mxu3 %v1278_v51 }
 0x111   :  { %807 = vmatpush.msrb.mxu2 %v1297_v57  ;;  %866 = vmatpush.msrb.mxu3 %v1285_v54 }
 0x113   :  { %811 = vmatpush.msrb.mxu2 %v1314_v62  ;;  %868 = vmatpush.msrb.mxu3 %v1316_v63 }
 0x115   :  { %815 = vmatpush.msrb.mxu2 %v1341_v12  ;;  %870 = vmatpush.msrb.mxu3 %v1343_v13 }
 0x117   :  { %819 = vmatpush.msrb.mxu2 %v1359_v32  ;;  %872 = vmatpush.msrb.mxu3 %v1348_v26 }
 0x119   :  { %823 = vmatpush.msrb.mxu2 %v1365_v39 }
 0x11b   :  { %827 = vmatpush.msrb.mxu2 %v1389_v61 }
 0x11d   :  { %831 = vmatpush.msrb.mxu2 %v1403_v7 }
 0x11f   :  { %835 = vmatpush.msrb.mxu2 %v1414_v42 }
 0x153   :  { %v438_v3 = vpop.f32.mrf.mxu3 }
 0x15b   :  { %v412_v4 = vpop.f32.mrf.mxu2  ;;  %v486_v5 = vpop.f32.mrf.mxu3 }
 0x15c   :  { %v439_v10 = vadd.f32 %v438_v3, %v412_v4 }
 0x163   :  { %v462_v9 = vpop.f32.mrf.mxu2  ;;  %v532_v24 = vpop.f32.mrf.mxu3 }
 0x164   :  { %v463_v11 = vadd.f32 %v462_v9, %v439_v10 }
 0x166   :  { %v487_v17 = vadd.f32 %v486_v5, %v463_v11 }
 0x16b   :  { %v510_v22 = vpop.f32.mrf.mxu2 }
 0x16c   :  { %v511_v23 = vadd.f32 %v510_v22, %v487_v17 }
 0x16e   :  { %v533_v25 = vadd.f32 %v532_v24, %v511_v23 }
 0x170   :  { %v1595_v28 = vsub.f32 %v1643_v27, %v533_v25 }
 0x172   :  { %v536_v33 = vmul.f32 %v1595_v28, %v1595_v28 }
 0x174   :  { %v569_v34 = vand.u32 4294901760, %v536_v33 }
 0x176   :  { %675 = vmatmul.f32.vlgmr.msra.gmra.mxu3 %v569_v34  ;;  %v570_v35 = vsub.f32 %v536_v33, %v569_v34 }
 0x178   :  { %729 = vmatmul.f32.vlgmr.msra.gmra.mxu0 %v570_v35  ;;  %v571_v41 = vand.u32 4294901760, %v570_v35 }
 0x179   :  { %962 = vmatpush.msra.mxu0 %v1516_v19 }
 0x17a   :  { %768 = vmatmul.f32.vlgmr.msra.gmra.mxu1 %v571_v41  ;;  %v572_v45 = vsub.f32 %v570_v35, %v571_v41 }
 0x17b   :  { %985 = vmatpush.msra.mxu1 %v1513_v16 }
 0x17c   :  { %v573_v50 = vand.u32 4294901760, %v572_v45 }
 0x17e   :  { %574 = vmatmul.f32.vlgmr.msra.gmra.mxu2 %v573_v50  ;;  %874 = vmatmul.f32.vlgmr.msrb.gmra.mxu3 %v569_v34 }
 0x186   :  { %837 = vmatmul.f32.vlgmr.msrb.gmra.mxu2 %v569_v34 }
 0x1f5   :  { %v730_v59 = vpop.f32.mrf.mxu0 }
 0x1f7   :  { %v769_v63 = vpop.f32.mrf.mxu1 }
 0x1f9   :  { %v676_v51 = vpop.f32.mrf.mxu3 }
 0x201   :  { %v575_v54 = vpop.f32.mrf.mxu2  ;;  %v875_v13 = vpop.f32.mrf.mxu3 }
 0x202   :  { %v677_v57 = vadd.f32 %v676_v51, %v575_v54 }
 0x204   :  { %v731_v62 = vadd.f32 %v730_v59, %v677_v57 }
 0x206   :  { %v770_v2 = vadd.f32 %v769_v63, %v731_v62 }
 0x209   :  { %v838_v7 = vpop.f32.mrf.mxu2 }
 0x20a   :  { %v839_v12 = vadd.f32 %v838_v7, %v770_v2 }
 0x20c   :  { %v876_v26 = vadd.f32 %v875_v13, %v839_v12 }
 0x20e   :  { %v878_v32 = vmul.f32 0.03125, %v876_v26 }
 0x210   :  { %v879_v39 = vadd.f32 1e-05, %v878_v32 }
 0x212   :  { %1070 = vrsqrt.f32 %v879_v39  ;;  %vm886_vm3 = vweird.f32 %v879_v39 }
 0x218   :  { %v1071_v42 = vpop.eup %1070 }
 0x219   :  { %v881_v61 = vmul.f32 %v1071_v42, %v879_v39  ;;  %vm887_vm2 = vweird.f32 %v1071_v42 }
 0x21a   :  { %vm888_vm4 = vmor %vm886_vm3, %vm887_vm2 }
 0x21b   :  { %v882_v1 = vmul.f32 %v1071_v42, %v881_v61 }
 0x21d   :  { %v883_v31 = vmul.f32 0.5, %v882_v1 }
 0x21f   :  { %v884_v44 = vsub.f32 1.5, %v883_v31 }
 0x221   :  { %v885_v19 = vmul.f32 %v1071_v42, %v884_v44 }
 0x223   :  { %v889_v46 = vsel %vm888_vm4, %v1071_v42, %v885_v19 }
 0x224   :  { %v891_v52 = vsel %vm381_vm1, %v889_v46, 0 }
 0x225   :  { %v910_v56 = vand.u32 4294901760, %v891_v52 }
 0x227   :  { %v911_v58 = vsub.f32 %v891_v52, %v910_v56  ;;  %941 = vmatmul.f32.vlgmr.msrb.gmra.mxu1 %v910_v56 }
 0x228   :  { %1033 = vmatpush.msrb.mxu1 %v1513_v16 }
 0x229   :  { %v912_v0 = vand.u32 4294901760, %v911_v58 }
 0x22b   :  { %v913_v6 = vsub.f32 %v911_v58, %v912_v0 }
 0x22d   :  { %v914_v18 = vand.u32 4294901760, %v913_v6 }
 0x22f   :  { %915 = vmatmul.f32.vlgmr.msrb.gmra.mxu0 %v914_v18  ;;  %989 = vmatmul.f32.vlgmr.msra.gmra.mxu1 %v912_v0 }
 0x230   :  { %1011 = vmatpush.msrb.mxu0 %v1521_v20 }
 0x237   :  { %965 = vmatmul.f32.vlgmr.msra.gmra.mxu0 %v911_v58  ;;  %1035 = vmatmul.f32.vlgmr.msrb.gmra.mxu1 %v910_v56 }
 0x23f   :  { %1013 = vmatmul.f32.vlgmr.msrb.gmra.mxu0 %v910_v56 }
 0x2a4   :  { %v942_v30 = vpop.f32.mrf.mxu1 }
 0x2ac   :  { %v916_v36 = vpop.f32.mrf.mxu0  ;;  %v990_v47 = vpop.f32.mrf.mxu1 }
 0x2ad   :  { %v943_v53 = vadd.f32 %v942_v30, %v916_v36 }
 0x2b4   :  { %v966_v48 = vpop.f32.mrf.mxu0  ;;  %v1036_v16 = vpop.f32.mrf.mxu1 }
 0x2b5   :  { %v967_v60 = vadd.f32 %v966_v48, %v943_v53 }
 0x2b7   :  { %v991_v8 = vadd.f32 %v990_v47, %v967_v60 }
 0x2bc   :  { %v1014_v55 = vpop.f32.mrf.mxu0 }
 0x2bd   :  { %v1015_v14 = vadd.f32 %v1014_v55, %v991_v8 }
 0x2bf   :  { %v1037_v15 = vadd.f32 %v1036_v16, %v1015_v14 }
 0x2c1   :  { %v1039_v20 = vmul.f32 %v1037_v15, %v1595_v28 }
 0x2c3   :  { %v1044_v40 = vmul.f32 %v1068_v21, %v1039_v20 }
 0x2c5   :  { %v1049_v37 = vadd.f32 %v1069_v29, %v1044_v40 }
 0x2c7   :  { %1050 = vst [vmem:[#allocation2] sm:$0xf] %v1049_v37 }
 0x2c8   :  { %1061 = dma.vmem_to_hbm [thread:$0]  %s1057_s6, 64, %s1059_s9, [#allocation3]  }
 0x2c9   :  { %1096 = dma.done.wait [#allocation3], 64  }
 0x2ca   :  { %1097 = vsyncadd [#allocation3], 4294967232 }
 0x2cb   :  { %1066 = vsyncpa [#allocation3], 1 }

// kernel: tpu_custom_call.1
= control target key start
LH: loop header
LB: loop body
LE: loop exit
PB: predicated region body
PF: predicated region fallthrough
CT: control target
= control target key end

     0   :  { %8 = vsyncpa [#allocation3], 0  ;;  %s710_s0 = inlined_call_operand.hbm [shape: f32[16,32], index: 0, kind: input, shape index: {}]   ;;  %s711_s1 = inlined_call_operand.hbm [shape: f32[1,32], index: 1, kind: input, shape index: {}]   ;;  %s712_s2 = inlined_call_operand.vmem [shape: f32[1,32], index: 2, kind: input, shape index: {}]   ;;  %s713_s3 = inlined_call_operand.hbm [shape: f32[16,32], index: 3, kind: output, shape index: {}]  }
   0x1   :  { %10 = vsyncpa [#allocation3 + $0x1], 0 }
   0x2   :  { %11 = vsyncpa [#allocation6], 0 }
   0x3   :  { %12 = vsyncpa [#allocation4], 0 }
   0x4   :  { %14 = vsyncpa [#allocation4 + $0x1], 0  ;;  %s562_s12 = smov 0   ;;  %s564_s13 = smov 0  }
   0x5   :  { %s566_s14 = smov 0   ;;  %s568_s15 = smov 0  }
   0x6 LB: > { %s583_s16 = sadd.s32 4294967295, %s539_s15   ;;  %s334_s17 = sadd.s32 4294967294, %s539_s15   ;;  %s539_s15 = sphi %s568_s15, %s723_s15   ;;  %s535_s14 = sphi %s566_s14, %s722_s14   ;;  %s531_s13 = sphi %s564_s13, %s721_s13   ;;  %s527_s12 = sphi %s562_s12, %s720_s12  }
   0x7   : > { %p40_p0 = scmp.ne.s32.totalorder %s531_s13, %s527_s12  ;;  %p41_p1 = scmp.eq.s32.totalorder %s583_s16, 0 }
   0x8   : > { %p106_p2 = scmp.eq.s32.totalorder %s583_s16, 1  ;;  %p112_p3 = scmp.eq.s32.totalorder %s334_s17, 1 }
   0x9   : > { %p592_p4 = por %p41_p1, %p40_p0  ;;  %p335_p5 = scmp.ge.s32.totalorder %s539_s15, 1 }
   0xa   : > { %p597_p6 = por %p112_p3, %p40_p0  ;;  %p119_p7 = scmp.lt.s32.totalorder %s539_s15, 3 }
   0xb   : > { %s131_s22 = sshll.u32 %s711_s1, 4  ;;  %s541_s24 = smov [#allocation5]   ;;  %s132_s22 = int_to_ptr.hbm [resolvable:$true] %s131_s22 }
   0xc   : > { %p605_p8 = pnand %p335_p5, %p119_p7  ;;  %s133_s25 = sshll.u32 %s541_s24, 4  ;;  %s134_s25 = int_to_ptr.vmem [resolvable:$true] %s133_s25 }
   0xd   : > { %s615_s26 = sadd.s32 1, %s539_s15   ;;  %s27_s27 = sadd.s32 1, %s535_s14 }
   0xe   : > { %p356_p10 = pneg %p605_p8  ;;  %s24_s28 = ssub.s32 %s539_s15, %s615_s26 }
   0xf   : > { %p25_p12 = scmp.eq.s32.totalorder %s24_s28, 0  ;;  %p34_p13 = scmp.ne.s32.totalorder %s535_s14, %s531_s13 }
  0x10   : > { %p357_p11 = pnand %p356_p10, %p41_p1  ;;  %p35_p0 = scmp.eq.s32.totalorder %s539_s15, 0 }
  0x11   : > { %s624_s29 = scalar_select %p25_p12, %s535_s14, %s27_s27  }
  0x12   : > { %359 = dma.hbm_to_vmem [thread:$0]  (!%p357_p11), %s132_s22, 16, %s134_s25, [#allocation6]  }
  0x13   : > { %p628_p3 = por %p106_p2, %p34_p13  ;;  %p369_p5 = scmp.lt.s32.totalorder %s539_s15, 2 }
  0x14   : > { %s147_s4 = sand.u32 1, %s535_s14   ;;  %s339_s5 = sshll.u32 %s539_s15, 3 }
  0x15   : > { %p36_p7 = por %p35_p0, %p34_p13  ;;  %s338_s6 = sshll.u32 %s147_s4, 3 }
  0x16   : > { %s155_s9 = scalar_lea.hbm %s710_s0, %s339_s5  ;;  %s151_s11 = scalar_lea.vmem [#allocation2], %s338_s6 }
  0x17   : > { %s157_s10 = sshll.u32 %s155_s9, 4  ;;  %s159_s17 = sshll.u32 %s151_s11, 4  ;;  %s158_s10 = int_to_ptr.hbm [resolvable:$true] %s157_s10  ;;  %s160_s17 = int_to_ptr.vmem [resolvable:$true] %s159_s17 }
  0x18   : > { %p638_p10 = pnand %p369_p5, %p36_p7  ;;  %s148_s21 = scalar_lea.sflag [#allocation3], %s147_s4 }
  0x19   : > { %s439_s22 = sshra.s32 %s158_s10, 4  ;;  %s446_s28 = scalar_lea.hbm %s710_s0, 16  ;;  %s440_s22 = int_to_ptr.hbm [resolvable:$true] %s439_s22 }
  0x1a   : > { %s441_s24 = scalar_lea.hbm %s440_s22, 8  ;;  %p443_p11 = pneg %p638_p10 }
  0x1b   : > { %p442_p2 = scmp.ne.s32.totalorder %s440_s22, %s441_s24  ;;  %p447_p0 = scmp.lt.s32.totalorder %s440_s22, %s710_s0 }
  0x1c   : > { %p448_p5 = scmp.lt.s32.totalorder %s446_s28, %s441_s24 }
  0x1d   : > { %p444_p12 = pnand %p443_p11, %p442_p2 }
  0x1e   : > { %p449_p7 = por %p448_p5, %p447_p0 }
  0x1f   : > { %p445_p13 = pneg %p444_p12 }
  0x21   : > { %p450_p9 = pnand %p449_p7, %p445_p13 }
  0x23   : > { %453 = shalt.err (!%p450_p9)
}
  0x24   : > { %363 = dma.hbm_to_vmem [thread:$0]  (!%p638_p10), %s158_s10, 128, %s160_s17, %s148_s21  }
  0x25   : > { %168 = sbr.rel (%p605_p8) target bundleno = 317 (0x13d), region = 32  ;;  %s655_s4 = sand.u32 (!%p605_p8), 1, %s531_s13  }
  0x26   : > { %s341_s7 = sshll.u32 (!%p605_p8), %s655_s4, 3  ;;  %s171_s8 = scalar_lea.sflag (!%p605_p8), [#allocation3], %s655_s4 }
  0x27   : > { %s174_s9 = scalar_lea.vmem (!%p605_p8), [#allocation2], %s341_s7 }
  0x2a   : > { %514 = dma.done.wait (%p592_p4), %s171_s8, 128  }
  0x2b   : > { %516 = vsyncadd (%p592_p4), %s171_s8, 4294967168 }
  0x2c   : > { %518 = dma.done.wait (%p41_p1), [#allocation6], 16  }
  0x2d   : > { %520 = vsyncadd (%p41_p1), [#allocation6], 4294967280  ;;  %vm204_vm0 = vcmask 261120   ;;  %v203_v0 = vld [vmem:[%s174_s9] sm:$0xff]  ;;  %s345_s18 = sshll.u32 %s583_s16, 3  ;;  %s202_s21 = scalar_lea.vmem [#allocation7], %s341_s7 }
  0x2e   : > { %v205_v1 = vsel %vm204_vm0, %v203_v0, 0.0  ;;  %v405_v16 = vld [vmem:[#allocation5] ss:$0 sm:$0xff]  ;;  %s249_s11 = scalar_lea.hbm %s713_s3, %s345_s18  ;;  %v406_v18 = vld [vmem:[%s712_s2] ss:$0 sm:$0xff]  ;;  %s251_s22 = sshll.u32 %s202_s21, 4  ;;  %s252_s22 = int_to_ptr.vmem [resolvable:$true] %s251_s22 }
  0x2f   : > { %206 = vadd.xlane.f32.xlu0 %v205_v1  ;;  %s253_s16 = sshll.u32 %s249_s11, 4  ;;  %s239_s24 = scalar_lea.sflag [#allocation4], %s655_s4  ;;  %s254_s16 = int_to_ptr.hbm [resolvable:$true] %s253_s16 }
  0x30   : > { %s483_s25 = sshra.s32 %s254_s16, 4  ;;  %s489_s6 = scalar_lea.hbm %s713_s3, 16  ;;  %s484_s25 = int_to_ptr.hbm [resolvable:$true] %s483_s25 }
  0x31   : > { %s485_s27 = scalar_lea.hbm %s484_s25, 8  ;;  %p490_p9 = scmp.lt.s32.totalorder %s484_s25, %s713_s3 }
  0x32   : > { %p486_p1 = scmp.ne.s32.totalorder %s484_s25, %s485_s27  ;;  %p491_p10 = scmp.lt.s32.totalorder %s489_s6, %s485_s27 }
  0x34   : > { %p487_p4 = pnand %p486_p1, %p628_p3  ;;  %p492_p2 = por %p491_p10, %p490_p9 }
  0x36   : > { %p488_p8 = pneg %p487_p4 }
  0x38   : > { %p493_p11 = pnand %p492_p2, %p488_p8 }
  0xa2   : > { %v207_v2 = vpop.xlane.xlu0 %206 }
  0xa3   : > { %v208_v3 = vmul.f32 0.03125, %v207_v2 }
  0xa5   : > { %v209_v4 = vsub.f32 %v203_v0, %v208_v3 }
  0xa7   : > { %v210_v5 = vmul.f32 %v209_v4, %v209_v4 }
  0xa9   : > { %v211_v6 = vsel %vm204_vm0, %v210_v5, 0.0 }
  0xaa   : > { %212 = vadd.xlane.f32.xlu0 %v211_v6 }
 0x11d   : > { %v213_v7 = vpop.xlane.xlu0 %212 }
 0x11e   : > { %v214_v8 = vmul.f32 0.03125, %v213_v7 }
 0x120   : > { %v215_v9 = vadd.f32 1e-05, %v214_v8 }
 0x122   : > { %407 = vrsqrt.f32 %v215_v9  ;;  %vm222_vm2 = vweird.f32 %v215_v9 }
 0x128   : > { %v408_v10 = vpop.eup %407 }
 0x129   : > { %v217_v11 = vmul.f32 %v408_v10, %v215_v9  ;;  %vm223_vm1 = vweird.f32 %v408_v10 }
 0x12a   : > { %vm224_vm3 = vmor %vm222_vm2, %vm223_vm1 }
 0x12b   : > { %v218_v12 = vmul.f32 %v408_v10, %v217_v11 }
 0x12d   : > { %v219_v13 = vmul.f32 0.5, %v218_v12 }
 0x12f   : > { %v220_v14 = vsub.f32 1.5, %v219_v13 }
 0x131   : > { %v221_v15 = vmul.f32 %v408_v10, %v220_v14 }
 0x133   : > { %v225_v17 = vsel %vm224_vm3, %v408_v10, %v221_v15 }
 0x134   : > { %v226_v19 = vmul.f32 %v225_v17, %v209_v4 }
 0x136   : > { %v231_v20 = vmul.f32 %v405_v16, %v226_v19 }
 0x138   : > { %v236_v21 = vadd.f32 %v406_v18, %v231_v20 }
 0x13a   : > { %237 = vst.msk [vmem:[%s202_s21] sm:$0xff] %vm204_vm0, %v236_v21 }
 0x13b   : > { %496 = shalt.err (!%p493_p11)
}
 0x13c   : > { %354 = dma.vmem_to_hbm [thread:$0]  (%p628_p3), %s252_s22, 128, %s254_s16, %s239_s24  }
 0x13d PF: > { %s265_s4 = sand.u32 1, %s527_s12   ;;  %p719_p12 = scmp.ge.s32.totalorder %s539_s15, 2 }
 0x13e   : > { %s266_s9 = scalar_lea.sflag [#allocation4], %s265_s4 }
 0x13f   : > { %p365_p13 = pnand %p719_p12, %p597_p6 }
 0x141   : > { %p366_p0 = pneg %p365_p13 }
 0x143   : > { %522 = dma.done.wait (%p366_p0), %s266_s9, 128  }
 0x144   : > { %524 = vsyncadd (%p366_p0), %s266_s9, 4294967168  ;;  %p17_p5 = scmp.ge.s32.totalorder %s615_s26, 4   ;;  %s720_s12 = smov %s531_s13 }
 0x145   : > { %s721_s13 = smov %s535_s14  ;;  %s722_s14 = smov %s624_s29 }
 0x146   : > { %s723_s15 = smov %s615_s26  ;;  %19 = sbr.rel (!%p17_p5) target bundleno = 6 (0x6), region = 81 }
 0x14b   :  { %272 = vsyncpa [#allocation3], 1 }
 0x14c   :  { %274 = vsyncpa [#allocation3 + $0x1], 1 }
 0x14d   :  { %275 = vsyncpa [#allocation6], 1 }
 0x14e   :  { %276 = vsyncpa [#allocation4], 1 }
 0x14f   :  { %278 = vsyncpa [#allocation4 + $0x1], 1 }

</bundles_post_ra>
